<compile_context>
chip_gen: v5e
topology: v5e:2x2
jax: 0.10.0
libtpu: 0.0.40
codegen_flags: <defaults>
</compile_context>

<pallas_src>
import functools

import jax
import jax.numpy as jnp
from jax.experimental import pallas as pl
from jax.experimental.pallas import tpu as pltpu


def _msl_kernel(pred_ref, gt_ref, out_ref, acc_ref, *,
                epsilon: float, inv_hw: float, h_total: int, mask_h: bool):
    h = pl.program_id(1)
    last = pl.num_programs(1) - 1

    @pl.when(h == 0)
    def _():
        acc_ref[...] = jnp.zeros_like(acc_ref)

    # Load native-dtype tile, upcast on the VPU (hidden under the DMA).
    p = pred_ref[...].astype(jnp.float32)
    g = gt_ref[...].astype(jnp.float32)
    d = p - g
    v = jnp.sqrt(d * d + jnp.float32(epsilon))          # (bB, tH, W) f32

    if mask_h:
        # Only the final H tile can overrun; pay for the mask only there.
        @pl.when(h < last)
        def _():
            acc_ref[...] += jnp.sum(v, axis=1)

        @pl.when(h == last)
        def _():
            t_h = v.shape[1]
            row = jax.lax.broadcasted_iota(jnp.int32, v.shape, 1)
            valid = (h * t_h + row) < h_total
            acc_ref[...] += jnp.sum(jnp.where(valid, v, 0.0), axis=1)
    else:
        acc_ref[...] += jnp.sum(v, axis=1)

    @pl.when(h == last)
    def _():
        # Cross-lane W reduce + scale + narrow store: once per batch block.
        s = jnp.sum(acc_ref[...], axis=1, keepdims=True)  # (bB, 1)
        out_ref[...] = (s * jnp.float32(inv_hw))[None]    # (1, bB, 1)


def mean_square_loss(pred: jax.Array, gt: jax.Array, epsilon: float,
                     *, tile_bytes: int = 6 * 1024 * 1024) -> jax.Array:
    assert pred.shape == gt.shape and pred.ndim == 3
    B, H, W = pred.shape
    itemsize = jnp.dtype(pred.dtype).itemsize

    # Cap the per-input tile so 2 inputs x 2 buffers x tile + acc stays
    # <= ~44 MiB (headroom under v7x's 64 MiB physical VMEM per TC).
    tile_bytes = max(1, min(int(tile_bytes), 10 * 1024 * 1024))

    # Sublane packing of the input dtype (8 rows for f32, 16 for bf16, ...).
    sub = 8 if itemsize >= 4 else (32 // itemsize)

    # --- batch block: grow bB until a tile reaches tile_bytes (many small
    # images -> few big tiles instead of a huge grid of tiny tiles).
    row_bytes = H * W * itemsize
    bB = max(1, min(B, tile_bytes // max(1, row_bytes)))
    # v7x megacore: make sure the "parallel" batch axis has >= 2 grid steps.
    if B >= 2 and bB >= B:
        bB = (B + 1) // 2
    # Don't let a minimal (bB, sub, W) tile blow the VMEM budget for wide W.
    bB = max(1, min(bB, tile_bytes // max(1, sub * W * itemsize)))
    grid_b = pl.cdiv(B, bB)
    # TODO(synk): for extremely wide W (a single (1, sub, W) tile > ~10 MiB)
    # add a W grid axis with a second accumulation phase instead of one tile.

    # --- H block: fill tile_bytes per input tile, rounded to sublane packing.
    rows = max(1, tile_bytes // (bB * W * itemsize))
    if rows >= H:
        tH = H
    else:
        tH = max(sub, (rows // sub) * sub)
        if tH >= H:
            tH = H
    grid_h = pl.cdiv(H, tH)
    mask_h = (H % tH) != 0

    # Explicit scoped-VMEM request covering the double-buffered footprint.
    tile_in = bB * tH * W * itemsize
    acc_bytes = bB * max(W, 128) * 4
    footprint = 4 * tile_in + acc_bytes + (2 << 20)
    vmem_limit = int(min(max(footprint, 32 << 20), 56 << 20))

    kernel = functools.partial(
        _msl_kernel,
        epsilon=float(epsilon),
        inv_hw=1.0 / float(H * W),
        h_total=H,
        mask_h=mask_h,
    )

    cost = pl.CostEstimate(
        flops=4 * B * H * W,                 # sub, mul, add-eps, accumulate
        transcendentals=B * H * W,           # sqrt
        bytes_accessed=2 * B * H * W * itemsize + B * 4,
    )

    out = pl.pallas_call(
        kernel,
        # Padded-batch layout: trailing two dims of the out block always equal
        # the full array dims; padded rows are sliced off below.
        out_shape=jax.ShapeDtypeStruct((grid_b, bB, 1), jnp.float32),
        grid=(grid_b, grid_h),
        in_specs=[
            pl.BlockSpec((bB, tH, W), lambda b, h: (b, h, 0)),
            pl.BlockSpec((bB, tH, W), lambda b, h: (b, h, 0)),
        ],
        out_specs=pl.BlockSpec((1, bB, 1), lambda b, h: (b, 0, 0)),
        scratch_shapes=[pltpu.VMEM((bB, W), jnp.float32)],
        compiler_params=pltpu.CompilerParams(
            dimension_semantics=("parallel", "arbitrary"),
            vmem_limit_bytes=vmem_limit),
        cost_estimate=cost,
    )(pred, gt)

    return out.reshape(grid_b * bB)[:B]


def _ref(pred, gt, epsilon):
    v = jnp.sqrt((pred.astype(jnp.float32) - gt.astype(jnp.float32)) ** 2
                 + jnp.float32(epsilon))
    return jnp.mean(jnp.mean(v, axis=1), axis=1)


if __name__ == "__main__":
    epsilon = 1e-3
    key = jax.random.PRNGKey(0)

    # Case A: small, lane-aligned; batch split in two blocks (megacore path).
    kp, kg = jax.random.split(jax.random.fold_in(key, 0))
    pred = jax.random.normal(kp, (2, 8, 128), dtype=jnp.float32)
    gt = jax.random.normal(kg, (2, 8, 128), dtype=jnp.float32)
    loss = mean_square_loss(pred, gt, epsilon)
    jax.block_until_ready(loss)
    assert loss.shape == (2,)
    assert jnp.allclose(loss, _ref(pred, gt, epsilon), atol=1e-5, rtol=1e-4)

    # Case B: multi-step H reduction grid + last-tile H masking (tiny
    # tile_bytes just to exercise the pipelined accumulator path).
    kp, kg = jax.random.split(jax.random.fold_in(key, 1))
    pred = jax.random.normal(kp, (12, 44, 256), dtype=jnp.float32)
    gt = jax.random.normal(kg, (12, 44, 256), dtype=jnp.float32)
    loss = mean_square_loss(pred, gt, epsilon, tile_bytes=16 * 1024)
    jax.block_until_ready(loss)
    assert loss.shape == (12,)
    assert jnp.allclose(loss, _ref(pred, gt, epsilon), atol=1e-5, rtol=1e-4)

    # Case C: bf16 inputs read natively (no wrapper-side f32 materialization).
    kp, kg = jax.random.split(jax.random.fold_in(key, 2))
    pred = jax.random.normal(kp, (2, 16, 128), dtype=jnp.bfloat16)
    gt = jax.random.normal(kg, (2, 16, 128), dtype=jnp.bfloat16)
    loss = mean_square_loss(pred, gt, epsilon)
    jax.block_until_ready(loss)
    assert loss.shape == (2,)
    assert jnp.allclose(loss, _ref(pred, gt, epsilon), atol=1e-4, rtol=1e-3)

    # Case D: bB > 1 with a partial last batch block (padded rows sliced off).
    kp, kg = jax.random.split(jax.random.fold_in(key, 3))
    pred = jax.random.normal(kp, (10, 8, 128), dtype=jnp.float32)
    gt = jax.random.normal(kg, (10, 8, 128), dtype=jnp.float32)
    loss = mean_square_loss(pred, gt, epsilon, tile_bytes=16 * 1024)
    jax.block_until_ready(loss)
    assert loss.shape == (10,)
    assert jnp.allclose(loss, _ref(pred, gt, epsilon), atol=1e-5, rtol=1e-4)

    print("KERNEL_OK")
</pallas_src>

<mosaic_0001>
module attributes {stable_mosaic.version = 11 : i64} {
  func.func @_msl_kernel(%arg0: i32, %arg1: i32, %arg2: memref<1x8x128xf32, #tpu.memory_space<vmem>>, %arg3: memref<1x8x128xf32, #tpu.memory_space<vmem>>, %arg4: memref<1x1x1xf32, #tpu.memory_space<vmem>>, %arg5: memref<1x128xf32, #tpu.memory_space<vmem>>) attributes {dimension_semantics = [#tpu.dimension_semantics<parallel>, #tpu.dimension_semantics<arbitrary>], iteration_bounds = array<i64: 2, 1>, scalar_prefetch = 0 : i64, scratch_operands = 1 : i64, tpu.core_type = #tpu.core_type<tc>, window_params = [{transform_indices = @transform_0, window_bounds = array<i64: 1, 8, 128>}, {transform_indices = @transform_1, window_bounds = array<i64: 1, 8, 128>}, {transform_indices = @transform_2, window_bounds = array<i64: 1, 1, 1>}]} {
    %c0_i32 = arith.constant 0 : i32
    %0 = arith.cmpi eq, %arg1, %c0_i32 : i32
    %1 = arith.extui %0 : i1 to i32
    %c0_i32_0 = arith.constant 0 : i32
    %2 = arith.cmpi ne, %1, %c0_i32_0 : i32
    scf.if %2 {
      %cst_13 = arith.constant 0.000000e+00 : f32
      %17 = vector.broadcast %cst_13 : f32 to vector<1x128xf32>
      %c0_14 = arith.constant 0 : index
      %c0_15 = arith.constant 0 : index
      %18 = vector.load %arg5[%c0_14, %c0_15] : memref<1x128xf32, #tpu.memory_space<vmem>>, vector<1x128xf32>
      tpu.vector_store %arg5[%c0_14, %c0_15], %17 {strides = array<i32>} : memref<1x128xf32, #tpu.memory_space<vmem>>, vector<1x128xf32>,
    } else {
    }
    %c0 = arith.constant 0 : index
    %c0_1 = arith.constant 0 : index
    %c0_2 = arith.constant 0 : index
    %3 = vector.load %arg2[%c0, %c0_1, %c0_2] : memref<1x8x128xf32, #tpu.memory_space<vmem>>, vector<1x8x128xf32>
    %c0_3 = arith.constant 0 : index
    %c0_4 = arith.constant 0 : index
    %c0_5 = arith.constant 0 : index
    %4 = vector.load %arg3[%c0_3, %c0_4, %c0_5] : memref<1x8x128xf32, #tpu.memory_space<vmem>>, vector<1x8x128xf32>
    %5 = arith.subf %3, %4 : vector<1x8x128xf32>
    %6 = arith.mulf %5, %5 : vector<1x8x128xf32>
    %cst = arith.constant 1.000000e-03 : f32
    %7 = vector.broadcast %cst : f32 to vector<1x8x128xf32>
    %8 = arith.addf %6, %7 : vector<1x8x128xf32>
    %9 = math.sqrt %8 : vector<1x8x128xf32>
    %c0_6 = arith.constant 0 : index
    %c0_7 = arith.constant 0 : index
    %10 = vector.load %arg5[%c0_6, %c0_7] : memref<1x128xf32, #tpu.memory_space<vmem>>, vector<1x128xf32>
    %cst_8 = arith.constant dense<0.000000e+00> : vector<1x128xf32>
    %11 = vector.multi_reduction <add>, %9, %cst_8 [1] : vector<1x8x128xf32> to vector<1x128xf32>
    %12 = arith.addf %10, %11 : vector<1x128xf32>
    %c0_9 = arith.constant 0 : index
    %c0_10 = arith.constant 0 : index
    %13 = vector.load %arg5[%c0_9, %c0_10] : memref<1x128xf32, #tpu.memory_space<vmem>>, vector<1x128xf32>
    tpu.vector_store %arg5[%c0_9, %c0_10], %12 {strides = array<i32>} : memref<1x128xf32, #tpu.memory_space<vmem>>, vector<1x128xf32>,
    %c0_i32_11 = arith.constant 0 : i32
    %14 = arith.cmpi eq, %arg1, %c0_i32_11 : i32
    %15 = arith.extui %14 : i1 to i32
    %c0_i32_12 = arith.constant 0 : i32
    %16 = arith.cmpi ne, %15, %c0_i32_12 : i32
    scf.if %16 {
      %c0_13 = arith.constant 0 : index
      %c0_14 = arith.constant 0 : index
      %17 = vector.load %arg5[%c0_13, %c0_14] : memref<1x128xf32, #tpu.memory_space<vmem>>, vector<1x128xf32>
      %cst_15 = arith.constant dense<0.000000e+00> : vector<1xf32>
      %18 = vector.multi_reduction <add>, %17, %cst_15 [1] : vector<1x128xf32> to vector<1xf32>
      %19 = vector.shape_cast %18 : vector<1xf32> to vector<1x1xf32>
      %cst_16 = arith.constant 9.765625E-4 : f32
      %20 = vector.broadcast %cst_16 : f32 to vector<1x1xf32>
      %21 = arith.mulf %19, %20 : vector<1x1xf32>
      %22 = vector.shape_cast %21 : vector<1x1xf32> to vector<1x1x1xf32>
      %c0_17 = arith.constant 0 : index
      %c0_18 = arith.constant 0 : index
      %c0_19 = arith.constant 0 : index
      %23 = vector.load %arg4[%c0_17, %c0_18, %c0_19] : memref<1x1x1xf32, #tpu.memory_space<vmem>>, vector<1x1x1xf32>
      tpu.vector_store %arg4[%c0_17, %c0_18, %c0_19], %22 {strides = array<i32>} : memref<1x1x1xf32, #tpu.memory_space<vmem>>, vector<1x1x1xf32>,
    } else {
    }
    return
  }
  func.func @transform_0(%arg0: i32, %arg1: i32) -> (i32, i32, i32) {
    %c0_i32 = arith.constant 0 : i32
    %c0_i32_0 = arith.constant 0 : i32
    return %arg0, %arg1, %c0_i32 : i32, i32, i32
  }
  func.func @transform_1(%arg0: i32, %arg1: i32) -> (i32, i32, i32) {
    %c0_i32 = arith.constant 0 : i32
    %c0_i32_0 = arith.constant 0 : i32
    return %arg0, %arg1, %c0_i32 : i32, i32, i32
  }
  func.func @transform_2(%arg0: i32, %arg1: i32) -> (i32, i32, i32) {
    %c0_i32 = arith.constant 0 : i32
    %c0_i32_0 = arith.constant 0 : i32
    %c0_i32_1 = arith.constant 0 : i32
    return %arg0, %c0_i32, %c0_i32_0 : i32, i32, i32
  }
}

</mosaic_0001>

<bundles_post_ra>
// kernel: tpu_custom_call.1
= control target key start
LH: loop header
LB: loop body
LE: loop exit
PB: predicated region body
PF: predicated region fallthrough
CT: control target
= control target key end

     0   :  { %7 = vsyncpa [#allocation4], 0  ;;  %s653_s0 = inlined_call_operand.hbm [shape: f32[2,8,128], index: 0, kind: input, shape index: {}]   ;;  %s654_s1 = inlined_call_operand.hbm [shape: f32[2,8,128], index: 1, kind: input, shape index: {}]   ;;  %s655_s2 = inlined_call_operand.vmem [shape: f32[2,1,1], index: 2, kind: output, shape index: {}]  }
   0x1   :  { %9 = vsyncpa [#allocation4 + $0x1], 0 }
   0x2   :  { %10 = vsyncpa [#allocation6], 0 }
   0x3   :  { %12 = vsyncpa [#allocation6 + $0x1], 0  ;;  %s558_s9 = smov 0   ;;  %s560_s10 = smov 0  }
   0x4   :  { %s562_s11 = smov 0   ;;  %s564_s12 = smov 0  }
   0x5   :  { %s566_s13 = smov 0   ;;  %s568_s14 = smov 0  }
   0x6 LB: > { %s350_s15 = sadd.s32 4294967295, %s540_s14   ;;  %s30_s16 = sadd.s32 1, %s536_s13  ;;  %s540_s14 = sphi %s568_s14, %s18_s14   ;;  %s536_s13 = sphi %s566_s13, %s662_s13   ;;  %s532_s12 = sphi %s564_s12, %s661_s12   ;;  %s528_s11 = sphi %s562_s11, %s660_s11   ;;  %s524_s10 = sphi %s560_s10, %s659_s10   ;;  %s520_s9 = sphi %s558_s9, %s658_s9  }
   0x7   : > { %p32_p0 = scmp.ge.s32.totalorder %s30_s16, 2  ;;  %s39_s17 = sadd.s32 1, %s528_s11 }
   0x8   : > { %p46_p1 = scmp.ne.s32.totalorder %s528_s11, %s524_s10  ;;  %p47_p2 = scmp.eq.s32.totalorder %s540_s14, 0 }
   0x9   : > { %s664_s16 = smov (%p32_p0, %s30_s16), 0  ;;  %p52_p4 = scmp.ne.s32.totalorder %s524_s10, %s520_s9 }
   0xa   : > { %p594_p3 = por %p47_p2, %p46_p1  ;;  %s34_s19 = ssub.s32 %s536_s13, %s664_s16 }
   0xb   : > { %p53_p5 = scmp.eq.s32.totalorder %s350_s15, 0  ;;  %p37_p6 = scmp.eq.s32.totalorder %s34_s19, 0 }
   0xc   : > { %p374_p8 = scmp.lt.s32.totalorder %s540_s14, 2  ;;  %s130_s22 = sand.u32 1, %s528_s11  }
   0xd   : > { %p601_p7 = por %p53_p5, %p52_p4  ;;  %s355_s23 = sshll.u32 %s536_s13, 3 }
   0xe   : > { %s607_s21 = scalar_select %p37_p6, %s528_s11, %s39_s17  }
   0xf   : > { %s354_s24 = sshll.u32 %s130_s22, 3  ;;  %s139_s27 = scalar_lea.hbm %s653_s0, %s355_s23 }
  0x10   : > { %s141_s28 = sshll.u32 %s139_s27, 4  ;;  %s134_s29 = scalar_lea.vmem [#allocation3], %s354_s24  ;;  %s142_s28 = int_to_ptr.hbm [resolvable:$true] %s141_s28 }
  0x11   : > { %s143_s30 = sshll.u32 %s134_s29, 4  ;;  %p368_p9 = pnand %p374_p8, %p594_p3  ;;  %s144_s30 = int_to_ptr.vmem [resolvable:$true] %s143_s30 }
  0x12   : > { %p358_p10 = scmp.ge.s32.totalorder %s540_s14, 1  ;;  %p168_p11 = scmp.lt.s32.totalorder %s540_s14, 3 }
  0x13   : > { %s131_s3 = scalar_lea.sflag [#allocation4], %s130_s22  ;;  %s159_s6 = scalar_lea.hbm %s654_s1, %s355_s23 }
  0x14   : > { %370 = dma.hbm_to_vmem [thread:$0]  (!%p368_p9), %s142_s28, 128, %s144_s30, %s131_s3  }
  0x15   : > { %p169_p12 = pnand %p358_p10, %p168_p11  ;;  %s161_s7 = sshll.u32 %s159_s6, 4  ;;  %s162_s7 = int_to_ptr.hbm [resolvable:$true] %s161_s7 }
  0x16   : > { %s154_s8 = scalar_lea.vmem [#allocation5], %s354_s24  ;;  %s151_s15 = scalar_lea.sflag [#allocation6], %s130_s22 }
  0x17   : > { %s163_s9 = sshll.u32 %s154_s8, 4  ;;  %172 = sbr.rel (%p169_p12) target bundleno = 201 (0xc9), region = 28  ;;  %s164_s9 = int_to_ptr.vmem [resolvable:$true] %s163_s9 }
  0x18   : > { %373 = dma.hbm_to_vmem [thread:$0]  (!%p368_p9), %s162_s7, 128, %s164_s9, %s151_s15  }
  0x19   : > { %s174_s17 = sand.u32 (!%p169_p12), 1, %s524_s10  }
  0x1a   : > { %s359_s18 = sshll.u32 (!%p169_p12), %s174_s17, 3  ;;  %s175_s19 = scalar_lea.sflag (!%p169_p12), [#allocation4], %s174_s17 }
  0x1b   : > { %s178_s25 = scalar_lea.vmem (!%p169_p12), [#allocation3], %s359_s18 }
  0x1c   : > { %511 = dma.done.wait (%p601_p7), %s175_s19, 128  }
  0x1d   : > { %513 = vsyncadd (%p601_p7), %s175_s19, 4294967168  ;;  %s185_s23 = scalar_lea.sflag [#allocation6], %s174_s17  ;;  %s188_s24 = scalar_lea.vmem [#allocation5], %s359_s18 }
  0x1e   : > { %515 = dma.done.wait (%p601_p7), %s185_s23, 128  }
  0x1f   : > { %517 = vsyncadd (%p601_p7), %s185_s23, 4294967168  ;;  %v542_v0 = vmov 0.0   ;;  %v221_v1 = vld [vmem:[%s178_s25] sm:$0xff]  ;;  %v222_v2 = vld [vmem:[%s188_s24] sm:$0xff]  ;;  %vm251_vm2 = vcmask 1040384   ;;  %p213_p13 = scmp.lt.s32.totalorder %s532_s12, 1 }
  0x20   : > { %220 = vst [vmem:[#allocation2] sm:$0x1] %v542_v0  ;;  %v223_v3 = vsub.f32 %v221_v1, %v222_v2  ;;  %vm256_vm3 = vcmask 0  }
  0x21   : > { %s666_s12 = smov (!%p213_p13, %s532_s12), 1 }
  0x22   : > { %v224_v4 = vmul.f32 %v223_v3, %v223_v3  ;;  %s215_s26 = scalar_lea.vmem %s655_s2, %s666_s12 }
  0x24   : > { %v225_v5 = vadd.f32 0.001, %v224_v4 }
  0x26   : > { %424 = vrsqrt.f32 %v225_v5  ;;  %vm233_vm0 = vcmp.eq.f32.partialorder %v225_v5, inf  ;;  %v236_v12 = vand.u32 2147483648, %v225_v5  ;;  %vm235_vm1 = vcmp.eq.f32.partialorder %v225_v5, 0.0 }
  0x27   : > { %v238_v21 = vld [vmem:[#allocation2] sm:$0x1] }
  0x2c   : > { %v425_v6 = vpop.eup %424 }
  0x2d   : > { %v227_v7 = vmul.f32 %v425_v6, %v225_v5 }
  0x2f   : > { %v228_v8 = vmul.f32 %v425_v6, %v227_v7 }
  0x31   : > { %v229_v9 = vmul.f32 0.5, %v228_v8 }
  0x33   : > { %v230_v10 = vsub.f32 1.5, %v229_v9 }
  0x35   : > { %v231_v11 = vmul.f32 %v425_v6, %v230_v10 }
  0x37   : > { %v232_v13 = vmul.f32 %v231_v11, %v225_v5 }
  0x39   : > { %v234_v14 = vsel %vm233_vm0, %v225_v5, %v232_v13 }
  0x3a   : > { %v237_v15 = vsel %vm235_vm1, %v236_v12, %v234_v14 }
  0x3b   : > { %v239_v16 = vrot.slane %v237_v15, 4 }
  0x3d   : > { %v240_v17 = vadd.f32 %v239_v16, %v237_v15 }
  0x3f   : > { %v241_v18 = vrot.slane %v240_v17, 2 }
  0x41   : > { %v242_v19 = vadd.f32 %v241_v18, %v240_v17 }
  0x43   : > { %v243_v20 = vrot.slane %v242_v19, 1 }
  0x45   : > { %v244_v22 = vadd.f32 %v243_v20, %v242_v19 }
  0x47   : > { %v245_v23 = vadd.f32 %v244_v22, %v238_v21 }
  0x49   : > { %246 = vst [vmem:[#allocation2] sm:$0x1] %v245_v23 }
  0x50   : > { %v250_v24 = vld [vmem:[#allocation2] sm:$0x1] }
  0x51   : > { %v252_v25 = vsel %vm251_vm2, %v250_v24, 0.0 }
  0x52   : > { %253 = vadd.xlane.f32.xlu0 %v252_v25 }
  0xc5   : > { %v254_v26 = vpop.xlane.xlu0 %253 }
  0xc6   : > { %v255_v27 = vmul.f32 0.0009765625, %v254_v26 }
  0xc8   : > { %257 = vst.msk [vmem:[%s215_s26] sm:$0x1] %vm256_vm3, %v255_v27 }
  0xc9 PF: > { %s18_s14 = sadd.s32 1, %s540_s14   ;;  %s658_s9 = smov %s524_s10 }
  0xca   : > { %p15_p0 = scmp.ge.s32.totalorder %s18_s14, 4   ;;  %s659_s10 = smov %s528_s11 }
  0xcb   : > { %s660_s11 = smov %s607_s21  ;;  %s661_s12 = smov %s536_s13 }
  0xcc   : > { %s662_s13 = smov %s664_s16  ;;  %17 = sbr.rel (!%p15_p0) target bundleno = 6 (0x6), region = 89 }
  0xd1   :  { %275 = vsyncpa [#allocation4], 1 }
  0xd2   :  { %277 = vsyncpa [#allocation4 + $0x1], 1 }
  0xd3   :  { %278 = vsyncpa [#allocation6], 1 }
  0xd4   :  { %280 = vsyncpa [#allocation6 + $0x1], 1 }

</bundles_post_ra>
